<compile_context>
chip_gen: v5e
topology: v5e:2x2
jax: 0.10.0
libtpu: 0.0.40
codegen_flags: <defaults>
</compile_context>

<pallas_src>
import jax
import jax.numpy as jnp
from jax.experimental import pallas as pl
from jax.experimental.pallas import tpu as pltpu


def _undoing_svm_kernel(dsid_ref,   # scalar prefetch (SMEM): (1,) int32
                        x_ref,      # (TN, F)    f32 -- streamed
                        w_ref,      # (F, 1)     f32 -- resident
                        b_ref,      # (1, 1)     f32 -- resident
                        dw_ref,     # (1, F, 1)  f32 -- selected dataset's delta_w
                        db_ref,     # (1, 1, 1)  f32 -- selected dataset's delta_b
                        out_ref):   # (TN, 2)    f32: [:, 0] = h, [:, 1] = h_bias
    del dsid_ref  # dataset selection already happened in the BlockSpec index_maps
    x = x_ref[...]                   # (TN, F)
    w = w_ref[...]                   # (F, 1)
    dw = dw_ref[0]                   # (F, 1)
    b = b_ref[...]                   # (1, 1)
    db = db_ref[0]                   # (1, 1)

    f = w.shape[0]
    # Fused RHS: column 0 = w, column 1 = w + dw.
    col_is_bias = (jax.lax.broadcasted_iota(jnp.int32, (f, 2), 1) == 1)
    w2 = w + col_is_bias.astype(jnp.float32) * dw              # (F, 2)

    h2 = jnp.dot(x, w2, preferred_element_type=jnp.float32)    # (TN, 2) -- single MXU push
    out_is_bias = (jax.lax.broadcasted_iota(jnp.int32, h2.shape, 1) == 1)
    h2 = h2 + b + out_is_bias.astype(jnp.float32) * db         # [+b, +b+db]

    out_ref[...] = h2.astype(out_ref.dtype)


def _pick_block_n(n, f, itemsize=4, x_budget_bytes=8 * 1024 * 1024):
    """Rows per tile: multiple of 8, double-buffered x tile well under VMEM on all chips."""
    max_rows = max(8, x_budget_bytes // (2 * f * itemsize))
    block_n = min(n, 1024, max_rows)
    if block_n >= n:
        return n                      # full extent always satisfies the (8,128) rule
    return max(8, (block_n // 8) * 8)


def undoing_svm_forward(x, dataset_id, w, b, delta_w, delta_b, *, block_n=None):
    """
    x:          (N, F)    float32
    dataset_id: (1,)      int32   (which per-dataset delta to apply)
    w:          (F, 1)    float32
    b:          (1,)      float32
    delta_w:    (D, F, 1) float32 (stacked per-dataset delta_w)
    delta_b:    (D,)      float32 (stacked per-dataset delta_b)
    returns (h, h_bias), each (N, 1) float32
    """
    n, f = x.shape
    d_num = delta_w.shape[0]

    if block_n is None:
        block_n = _pick_block_n(n, f)
    block_n = min(block_n, n)

    x = x.astype(jnp.float32)
    w2d = w.reshape(f, 1).astype(jnp.float32)
    b2d = b.reshape(1, 1).astype(jnp.float32)
    dw3d = delta_w.reshape(d_num, f, 1).astype(jnp.float32)
    db3d = delta_b.reshape(d_num, 1, 1).astype(jnp.float32)
    dsid = dataset_id.reshape(1).astype(jnp.int32)

    grid = (pl.cdiv(n, block_n),)

    grid_spec = pltpu.PrefetchScalarGridSpec(
        num_scalar_prefetch=1,
        grid=grid,
        in_specs=[
            pl.BlockSpec((block_n, f), lambda i, did: (i, 0)),        # x: streamed over N
            pl.BlockSpec((f, 1), lambda i, did: (0, 0)),              # w: resident
            pl.BlockSpec((1, 1), lambda i, did: (0, 0)),              # b: resident
            pl.BlockSpec((1, f, 1), lambda i, did: (did[0], 0, 0)),   # delta_w[d]: resident
            pl.BlockSpec((1, 1, 1), lambda i, did: (did[0], 0, 0)),   # delta_b[d]: resident
        ],
        out_specs=pl.BlockSpec((block_n, 2), lambda i, did: (i, 0)),
    )

    out = pl.pallas_call(
        _undoing_svm_kernel,
        out_shape=jax.ShapeDtypeStruct((n, 2), jnp.float32),
        grid_spec=grid_spec,
        compiler_params=pltpu.CompilerParams(
            dimension_semantics=("parallel",)),   # lets v7x shard N over both TCs
    )(dsid, x, w2d, b2d, dw3d, db3d)

    h = out[:, 0:1]
    h_bias = out[:, 1:2]
    return h, h_bias


if __name__ == "__main__":
    key = jax.random.PRNGKey(0)
    N, F, D = 256, 128, 3   # batch, in_feature, dataset_num

    k_x, k_w, k_b, k_dw, k_db = jax.random.split(key, 5)
    # torch.rand -> uniform [0, 1); mimic deterministically with jax.random.uniform.
    x = jax.random.uniform(k_x, (N, F), dtype=jnp.float32)
    w = jax.random.uniform(k_w, (F, 1), dtype=jnp.float32)
    b = jax.random.uniform(k_b, (1,), dtype=jnp.float32)
    delta_w = jax.random.uniform(k_dw, (D, F, 1), dtype=jnp.float32)
    delta_b = jax.random.uniform(k_db, (D,), dtype=jnp.float32)

    d = 1
    dataset_id = jnp.array([d], dtype=jnp.int32)

    # block_n=64 exercises the pipelined N tiling (grid of 4 steps).
    h, hb = undoing_svm_forward(x, dataset_id, w, b, delta_w, delta_b, block_n=64)
    h, hb = jax.block_until_ready((h, hb))

    hp = jax.lax.Precision.HIGHEST
    h_ref = jnp.dot(x, w, precision=hp) + b
    hb_ref = jnp.dot(x, w + delta_w[d], precision=hp) + b + delta_b[d]

    assert h.shape == (N, 1) and hb.shape == (N, 1)
    assert jnp.allclose(h, h_ref, atol=1e-4, rtol=1e-4), \
        float(jnp.max(jnp.abs(h - h_ref)))
    assert jnp.allclose(hb, hb_ref, atol=1e-4, rtol=1e-4), \
        float(jnp.max(jnp.abs(hb - hb_ref)))

    print("KERNEL_OK")
</pallas_src>

<mosaic_0001>
module attributes {stable_mosaic.version = 11 : i64} {
  func.func @_undoing_svm_kernel(%arg0: i32, %arg1: memref<1xi32, #tpu.memory_space<smem>>, %arg2: memref<64x128xf32, #tpu.memory_space<vmem>>, %arg3: memref<128x1xf32, #tpu.memory_space<vmem>>, %arg4: memref<1x1xf32, #tpu.memory_space<vmem>>, %arg5: memref<1x128x1xf32, #tpu.memory_space<vmem>>, %arg6: memref<1x1x1xf32, #tpu.memory_space<vmem>>, %arg7: memref<64x2xf32, #tpu.memory_space<vmem>>) attributes {dimension_semantics = [#tpu.dimension_semantics<parallel>], iteration_bounds = array<i64: 4>, scalar_prefetch = 1 : i64, scratch_operands = 0 : i64, tpu.core_type = #tpu.core_type<tc>, window_params = [{transform_indices = @transform_0, window_bounds = array<i64: 64, 128>}, {pipeline_mode = #tpu.pipeline_mode<synchronous>, transform_indices = @transform_1, window_bounds = array<i64: 128, 1>}, {pipeline_mode = #tpu.pipeline_mode<synchronous>, transform_indices = @transform_2, window_bounds = array<i64: 1, 1>}, {transform_indices = @transform_3, window_bounds = array<i64: 1, 128, 1>}, {transform_indices = @transform_4, window_bounds = array<i64: 1, 1, 1>}, {transform_indices = @transform_5, window_bounds = array<i64: 64, 2>}]} {
    %c0 = arith.constant 0 : index
    %c0_0 = arith.constant 0 : index
    %0 = vector.load %arg2[%c0, %c0_0] : memref<64x128xf32, #tpu.memory_space<vmem>>, vector<64x128xf32>
    %c0_1 = arith.constant 0 : index
    %c0_2 = arith.constant 0 : index
    %1 = vector.load %arg3[%c0_1, %c0_2] : memref<128x1xf32, #tpu.memory_space<vmem>>, vector<128x1xf32>
    %c0_3 = arith.constant 0 : index
    %c0_4 = arith.constant 0 : index
    %c0_5 = arith.constant 0 : index
    %2 = vector.load %arg5[%c0_3, %c0_4, %c0_5] : memref<1x128x1xf32, #tpu.memory_space<vmem>>, vector<1x128x1xf32>
    %3 = vector.shape_cast %2 : vector<1x128x1xf32> to vector<128x1xf32>
    %c0_6 = arith.constant 0 : index
    %c0_7 = arith.constant 0 : index
    %4 = vector.load %arg4[%c0_6, %c0_7] : memref<1x1xf32, #tpu.memory_space<vmem>>, vector<1x1xf32>
    %c0_8 = arith.constant 0 : index
    %c0_9 = arith.constant 0 : index
    %c0_10 = arith.constant 0 : index
    %5 = vector.load %arg6[%c0_8, %c0_9, %c0_10] : memref<1x1x1xf32, #tpu.memory_space<vmem>>, vector<1x1x1xf32>
    %6 = vector.shape_cast %5 : vector<1x1x1xf32> to vector<1x1xf32>
    %7 = tpu.iota {dimensions = array<i32: 1>} : vector<128x2xi32>
    %c1_i32 = arith.constant 1 : i32
    %8 = vector.broadcast %c1_i32 : i32 to vector<128x2xi32>
    %9 = arith.cmpi eq, %7, %8 : vector<128x2xi32>
    %10 = arith.extui %9 : vector<128x2xi1> to vector<128x2xi32>
    %11 = arith.sitofp %10 : vector<128x2xi32> to vector<128x2xf32>
    %12 = vector.broadcast %3 : vector<128x1xf32> to vector<128x2xf32>
    %13 = arith.mulf %11, %12 : vector<128x2xf32>
    %14 = vector.broadcast %1 : vector<128x1xf32> to vector<128x2xf32>
    %15 = arith.addf %14, %13 : vector<128x2xf32>
    %cst = arith.constant dense<0.000000e+00> : vector<64x2xf32>
    %16 = tpu.matmul %0, %15, %cst {dimension_numbers = #tpu.dot_dimension_numbers<[1], [0], [0], [1], [0, 0, 1, 1], [], []>} : vector<64x128xf32>, vector<128x2xf32>, vector<64x2xf32> -> vector<64x2xf32>
    %17 = tpu.iota {dimensions = array<i32: 1>} : vector<64x2xi32>
    %c1_i32_11 = arith.constant 1 : i32
    %18 = vector.broadcast %c1_i32_11 : i32 to vector<64x2xi32>
    %19 = arith.cmpi eq, %17, %18 : vector<64x2xi32>
    %20 = vector.broadcast %4 : vector<1x1xf32> to vector<64x2xf32>
    %21 = arith.addf %16, %20 : vector<64x2xf32>
    %22 = arith.extui %19 : vector<64x2xi1> to vector<64x2xi32>
    %23 = arith.sitofp %22 : vector<64x2xi32> to vector<64x2xf32>
    %24 = vector.broadcast %6 : vector<1x1xf32> to vector<64x2xf32>
    %25 = arith.mulf %23, %24 : vector<64x2xf32>
    %26 = arith.addf %21, %25 : vector<64x2xf32>
    %c0_12 = arith.constant 0 : index
    %c0_13 = arith.constant 0 : index
    %27 = vector.load %arg7[%c0_12, %c0_13] : memref<64x2xf32, #tpu.memory_space<vmem>>, vector<64x2xf32>
    tpu.vector_store %arg7[%c0_12, %c0_13], %26 {strides = array<i32>} : memref<64x2xf32, #tpu.memory_space<vmem>>, vector<64x2xf32>,
    return
  }
  func.func @transform_0(%arg0: i32, %arg1: memref<1xi32, #tpu.memory_space<smem>>) -> (i32, i32) {
    %c0_i32 = arith.constant 0 : i32
    %c0_i32_0 = arith.constant 0 : i32
    return %arg0, %c0_i32 : i32, i32
  }
  func.func @transform_1(%arg0: i32, %arg1: memref<1xi32, #tpu.memory_space<smem>>) -> (i32, i32) {
    %c0_i32 = arith.constant 0 : i32
    %c0_i32_0 = arith.constant 0 : i32
    %c0_i32_1 = arith.constant 0 : i32
    return %c0_i32, %c0_i32_0 : i32, i32
  }
  func.func @transform_2(%arg0: i32, %arg1: memref<1xi32, #tpu.memory_space<smem>>) -> (i32, i32) {
    %c0_i32 = arith.constant 0 : i32
    %c0_i32_0 = arith.constant 0 : i32
    %c0_i32_1 = arith.constant 0 : i32
    return %c0_i32, %c0_i32_0 : i32, i32
  }
  func.func @transform_3(%arg0: i32, %arg1: memref<1xi32, #tpu.memory_space<smem>>) -> (i32, i32, i32) {
    %c0 = arith.constant 0 : index
    %0 = memref.load %arg1[%c0] : memref<1xi32, #tpu.memory_space<smem>>
    %c0_i32 = arith.constant 0 : i32
    %c0_i32_0 = arith.constant 0 : i32
    %c0_i32_1 = arith.constant 0 : i32
    return %0, %c0_i32, %c0_i32_0 : i32, i32, i32
  }
  func.func @transform_4(%arg0: i32, %arg1: memref<1xi32, #tpu.memory_space<smem>>) -> (i32, i32, i32) {
    %c0 = arith.constant 0 : index
    %0 = memref.load %arg1[%c0] : memref<1xi32, #tpu.memory_space<smem>>
    %c0_i32 = arith.constant 0 : i32
    %c0_i32_0 = arith.constant 0 : i32
    %c0_i32_1 = arith.constant 0 : i32
    return %0, %c0_i32, %c0_i32_0 : i32, i32, i32
  }
  func.func @transform_5(%arg0: i32, %arg1: memref<1xi32, #tpu.memory_space<smem>>) -> (i32, i32) {
    %c0_i32 = arith.constant 0 : i32
    %c0_i32_0 = arith.constant 0 : i32
    return %arg0, %c0_i32 : i32, i32
  }
}

</mosaic_0001>

<bundles_post_ra>
// kernel: tpu_custom_call.1
= control target key start
LH: loop header
LB: loop body
LE: loop exit
PB: predicated region body
PF: predicated region fallthrough
CT: control target
= control target key end

     0   :  { %s802_s25 = smov 0   ;;  %s936_s0 = inlined_call_operand.<no memory space> [shape: s32[1], index: 0, kind: input, shape index: {}]   ;;  %s937_s1 = inlined_call_operand.vmem [shape: f32[256,128], index: 1, kind: input, shape index: {}]   ;;  %s938_s2 = inlined_call_operand.vmem [shape: f32[128,1], index: 2, kind: input, shape index: {}]   ;;  %s939_s3 = inlined_call_operand.<no memory space> [shape: f32[1,1], index: 3, kind: input, shape index: {}]   ;;  %s940_s4 = inlined_call_operand.vmem [shape: f32[3,128,1], index: 4, kind: input, shape index: {}]   ;;  %s941_s5 = inlined_call_operand.vmem [shape: f32[3,1,1], index: 5, kind: input, shape index: {}]   ;;  %s942_s6 = inlined_call_operand.vmem [shape: f32[256,2], index: 6, kind: output, shape index: {}]  }
   0x1   :  { %11 = sst [smem:[#allocation3]] %s936_s0  ;;  %v12_v0 = vstv %s939_s3 }
   0x2   :  { %13 = vst [vmem:[#allocation4] sm:$0x1] %v12_v0 }
   0x3 LB: > { %s673_s26 = sadd.s32 4294967295, %s757_s25   ;;  %p677_p0 = scmp.ge.s32.totalorder %s757_s25, 1  ;;  %s757_s25 = sphi %s802_s25, %s19_s25  }
   0x4   : > { %p218_p1 = scmp.lt.s32.totalorder %s757_s25, 5 }
   0x6   : > { %p219_p2 = pnand %p677_p0, %p218_p1 }
   0x7   : > { %s262_s29 = sld [smem:[#allocation3]] (!%p219_p2) }
   0x8   : > { %222 = sbr.rel (%p219_p2) target bundleno = 367 (0x16f), region = 40 }
   0xd   : > { %v303_v1 = vld [vmem:[%s938_s2 + $0x78] sm:$0xff]  ;;  %v302_v2 = vld [vmem:[%s938_s2 + $0x70] sm:$0xff]  ;;  %v759_v3 = vmov 0   ;;  %p263_p3 = scmp.lt.s32.totalorder %s262_s29, 2  ;;  %v300_v9 = vld [vmem:[%s938_s2 + $0x60] sm:$0xff]  ;;  %v322_v37 = vlaneseq  ;;  %v760_v41 = vmov 0.0  }
   0xe   : > { %747 = vset.pattern.permute.xlu2 %v759_v3  ;;  %746 = vset.pattern.permute.xlu1 %v759_v3  ;;  %v301_v10 = vld [vmem:[%s938_s2 + $0x68] sm:$0xff]  ;;  %v299_v11 = vld [vmem:[%s938_s2 + $0x58] sm:$0xff]  ;;  %v298_v16 = vld [vmem:[%s938_s2 + $0x50] sm:$0xff]  ;;  %vm581_vm1 = vcmask 15360  }
   0xf   : > { %500 = vperm.xlu1 %746, %v303_v1   ;;  %495 = vperm.xlu2 %747, %v302_v2   ;;  %s944_s29 = smov (!%p263_p3, %s262_s29), 2  ;;  %v297_v15 = vld [vmem:[%s938_s2 + $0x48] sm:$0xff]  ;;  %v296_v17 = vld [vmem:[%s938_s2 + $0x40] sm:$0xff]  ;;  %v294_v21 = vld [vmem:[%s938_s2 + $0x30] sm:$0xff]  ;;  %v323_v39 = vand.u32 127, %v322_v37 }
  0x10   : > { %748 = vset.pattern.permute.xlu0 %v759_v3  ;;  %s687_s30 = sshll.u32 %s944_s29, 7  ;;  %s272_s9 = scalar_lea.vmem %s941_s5, %s944_s29  ;;  %v295_v22 = vld [vmem:[%s938_s2 + $0x38] sm:$0xff]  ;;  %v293_v23 = vld [vmem:[%s938_s2 + $0x28] sm:$0xff]  ;;  %v292_v28 = vld [vmem:[%s938_s2 + $0x20] sm:$0xff] }
  0x11   : > { %s826_s12 = scalar_lea.vmem %s940_s4, %s687_s30  ;;  %v291_v27 = vld [vmem:[%s938_s2 + $0x18] sm:$0xff]  ;;  %v290_v29 = vld [vmem:[%s938_s2 + $0x10] sm:$0xff]  ;;  %v288_v31 = vld [vmem:[%s938_s2] sm:$0xff]  ;;  %vm324_vm0 = vcmp.eq.s32.totalorder %v323_v39, 1  ;;  %s678_s29 = sshll.u32 %s673_s26, 3 }
  0x12   : > { %v319_v4 = vld [vmem:[%s826_s12 + $0x78] sm:$0xff]  ;;  %v317_v5 = vld [vmem:[%s826_s12 + $0x68] sm:$0xff]  ;;  %v316_v6 = vld [vmem:[%s826_s12 + $0x60] sm:$0xff]  ;;  %v891_v42 = vsel %vm324_vm0, 1.0, %v760_v41  ;;  %p257_p4 = scmp.lt.s32.totalorder %s678_s29, 31 }
  0x13   : > { %404 = vperm.xlu0 %748, %v319_v4   ;;  %v318_v7 = vld [vmem:[%s826_s12 + $0x70] sm:$0xff]  ;;  %v315_v8 = vld [vmem:[%s826_s12 + $0x58] sm:$0xff]  ;;  %v313_v12 = vld [vmem:[%s826_s12 + $0x48] sm:$0xff] }
  0x14   : > { %v314_v13 = vld [vmem:[%s826_s12 + $0x50] sm:$0xff]  ;;  %v312_v14 = vld [vmem:[%s826_s12 + $0x40] sm:$0xff]  ;;  %v311_v19 = vld [vmem:[%s826_s12 + $0x38] sm:$0xff]  ;;  %s946_s29 = smov (!%p257_p4, %s678_s29), 31 }
  0x15   : > { %v310_v18 = vld [vmem:[%s826_s12 + $0x30] sm:$0xff]  ;;  %v309_v20 = vld [vmem:[%s826_s12 + $0x28] sm:$0xff]  ;;  %v307_v24 = vld [vmem:[%s826_s12 + $0x18] sm:$0xff] }
  0x16   : > { %v308_v25 = vld [vmem:[%s826_s12 + $0x20] sm:$0xff]  ;;  %v306_v26 = vld [vmem:[%s826_s12 + $0x10] sm:$0xff]  ;;  %v305_v32 = vld [vmem:[%s826_s12 + $0x8] sm:$0xff] }
  0x17   : > { %394 = vperm.xlu1 %746, %v317_v5   ;;  %389 = vperm.xlu2 %747, %v316_v6   ;;  %v304_v30 = vld [vmem:[%s826_s12] sm:$0xff]  ;;  %v289_v34 = vld [vmem:[%s938_s2 + $0x8] sm:$0xff] }
  0x18   : > { %v749_v33 = vld [vmem:[#allocation4] ss:$0 sm:$0xff] }
  0x19   : > { %v750_v35 = vld [vmem:[%s272_s9] ss:$0 sm:$0xff]  ;;  %s679_s9 = sshll.u32 %s946_s29, 3 }
  0x1a   : > { %s260_s22 = scalar_lea.vmem %s937_s1, %s679_s9  ;;  %s278_s0 = scalar_lea.vmem %s942_s6, %s679_s9 }
  0x1b   : > { %399 = vperm.xlu0 %748, %v318_v7   ;;  %v282_v41 = vld [vmem:[%s260_s22 + $0x10] sm:$0xff] }
  0x1f   : > { %384 = vperm.xlu1 %746, %v315_v8   ;;  %485 = vperm.xlu2 %747, %v300_v9  }
  0x23   : > { %490 = vperm.xlu0 %748, %v301_v10  }
  0x27   : > { %480 = vperm.xlu1 %746, %v299_v11   ;;  %374 = vperm.xlu2 %747, %v313_v12  }
  0x2b   : > { %379 = vperm.xlu0 %748, %v314_v13  }
  0x2f   : > { %369 = vperm.xlu1 %746, %v312_v14   ;;  %470 = vperm.xlu2 %747, %v297_v15  }
  0x33   : > { %475 = vperm.xlu0 %748, %v298_v16  }
  0x37   : > { %465 = vperm.xlu1 %746, %v296_v17   ;;  %359 = vperm.xlu2 %747, %v310_v18  }
  0x3b   : > { %364 = vperm.xlu0 %748, %v311_v19  }
  0x3f   : > { %354 = vperm.xlu1 %746, %v309_v20   ;;  %455 = vperm.xlu2 %747, %v294_v21  }
  0x43   : > { %460 = vperm.xlu0 %748, %v295_v22  }
  0x47   : > { %450 = vperm.xlu1 %746, %v293_v23   ;;  %344 = vperm.xlu2 %747, %v307_v24  }
  0x4b   : > { %349 = vperm.xlu0 %748, %v308_v25  }
  0x4f   : > { %339 = vperm.xlu1 %746, %v306_v26   ;;  %440 = vperm.xlu2 %747, %v291_v27  }
  0x53   : > { %445 = vperm.xlu0 %748, %v292_v28  }
  0x57   : > { %435 = vperm.xlu1 %746, %v290_v29   ;;  %329 = vperm.xlu2 %747, %v304_v30  }
  0x5b   : > { %334 = vperm.xlu0 %748, %v305_v32  }
  0x5f   : > { %425 = vperm.xlu1 %746, %v288_v31   ;;  %522 = vperm.xlu2 %747, %v749_v33  }
  0x63   : > { %430 = vperm.xlu0 %748, %v289_v34  }
  0x69   : > { %v496_v36 = vpop.permute.xlu2 %495 }
  0x6b   : > { %569 = vperm.xlu0 %748, %v750_v35  }
  0x71   : > { %v390_v40 = vpop.permute.xlu2 %389 }
  0x72   : > { %v419_v53 = vmul.f32 %v891_v42, %v390_v40  ;;  %v280_v40 = vld [vmem:[%s260_s22] sm:$0xff] }
  0x79   : > { %v486_v46 = vpop.permute.xlu2 %485 }
  0x7a   : > { %v515_v58 = vadd.f32 %v486_v46, %v419_v53  ;;  %v283_v46 = vld [vmem:[%s260_s22 + $0x18] sm:$0xff] }
  0x81   : > { %v501_v38 = vpop.permute.xlu1 %500  ;;  %v375_v52 = vpop.permute.xlu2 %374 }
  0x82   : > { %v416_v0 = vmul.f32 %v891_v42, %v375_v52 }
  0x85   : > { %v405_v43 = vpop.permute.xlu0 %404 }
  0x86   : > { %v422_v45 = vmul.f32 %v891_v42, %v405_v43  ;;  %v284_v43 = vld [vmem:[%s260_s22 + $0x20] sm:$0xff] }
  0x88   : > { %v518_v47 = vadd.f32 %v501_v38, %v422_v45  ;;  %v281_v45 = vld [vmem:[%s260_s22 + $0x8] sm:$0xff] }
  0x89   : > { %v395_v44 = vpop.permute.xlu1 %394  ;;  %v471_v61 = vpop.permute.xlu2 %470 }
  0x8a   : > { %525 = vmatpush.msra.mxu0 %v518_v47  ;;  %688 = vmatpush.msra.mxu1 %v518_v47  ;;  %v420_v54 = vmul.f32 %v891_v42, %v395_v44  ;;  %v512_v6 = vadd.f32 %v471_v61, %v416_v0  ;;  %v286_v44 = vld [vmem:[%s260_s22 + $0x30] sm:$0xff] }
  0x8b   : > { %689 = vmatpush.msra.mxu2 %v518_v47  ;;  %690 = vmatpush.msra.mxu3 %v518_v47  ;;  %v285_v47 = vld [vmem:[%s260_s22 + $0x28] sm:$0xff] }
  0x8d   : > { %v400_v48 = vpop.permute.xlu0 %399 }
  0x8e   : > { %v421_v50 = vmul.f32 %v891_v42, %v400_v48  ;;  %v287_v48 = vld [vmem:[%s260_s22 + $0x38] sm:$0xff] }
  0x90   : > { %v517_v51 = vadd.f32 %v496_v36, %v421_v50 }
  0x91   : > { %v385_v49 = vpop.permute.xlu1 %384  ;;  %v360_v5 = vpop.permute.xlu2 %359 }
  0x92   : > { %526 = vmatpush.msra.mxu0 %v517_v51  ;;  %691 = vmatpush.msra.mxu1 %v517_v51  ;;  %v418_v59 = vmul.f32 %v891_v42, %v385_v49  ;;  %v413_v15 = vmul.f32 %v891_v42, %v360_v5 }
  0x93   : > { %692 = vmatpush.msra.mxu2 %v517_v51  ;;  %693 = vmatpush.msra.mxu3 %v517_v51 }
  0x95   : > { %v491_v55 = vpop.permute.xlu0 %490 }
  0x96   : > { %v516_v57 = vadd.f32 %v491_v55, %v420_v54 }
  0x98   : > { %527 = vmatpush.msra.mxu0 %v516_v57  ;;  %694 = vmatpush.msra.mxu1 %v516_v57 }
  0x99   : > { %v481_v56 = vpop.permute.xlu1 %480  ;;  %695 = vmatpush.msra.mxu2 %v516_v57  ;;  %696 = vmatpush.msra.mxu3 %v516_v57  ;;  %v456_v11 = vpop.permute.xlu2 %455 }
  0x9a   : > { %v514_v60 = vadd.f32 %v481_v56, %v418_v59  ;;  %528 = vmatpush.msra.mxu0 %v515_v58  ;;  %697 = vmatpush.msra.mxu1 %v515_v58  ;;  %v509_v17 = vadd.f32 %v456_v11, %v413_v15 }
  0x9b   : > { %698 = vmatpush.msra.mxu2 %v515_v58  ;;  %699 = vmatpush.msra.mxu3 %v515_v58 }
  0x9c   : > { %529 = vmatpush.msra.mxu0 %v514_v60  ;;  %700 = vmatpush.msra.mxu1 %v514_v60 }
  0x9d   : > { %701 = vmatpush.msra.mxu2 %v514_v60  ;;  %702 = vmatpush.msra.mxu3 %v514_v60  ;;  %v380_v62 = vpop.permute.xlu0 %379 }
  0x9e   : > { %v417_v1 = vmul.f32 %v891_v42, %v380_v62 }
  0xa1   : > { %v370_v63 = vpop.permute.xlu1 %369  ;;  %v345_v20 = vpop.permute.xlu2 %344 }
  0xa2   : > { %v415_v7 = vmul.f32 %v891_v42, %v370_v63  ;;  %v410_v26 = vmul.f32 %v891_v42, %v345_v20 }
  0xa5   : > { %v476_v2 = vpop.permute.xlu0 %475 }
  0xa6   : > { %v513_v4 = vadd.f32 %v476_v2, %v417_v1 }
  0xa8   : > { %530 = vmatpush.msra.mxu0 %v513_v4  ;;  %703 = vmatpush.msra.mxu1 %v513_v4 }
  0xa9   : > { %v466_v3 = vpop.permute.xlu1 %465  ;;  %704 = vmatpush.msra.mxu2 %v513_v4  ;;  %705 = vmatpush.msra.mxu3 %v513_v4  ;;  %v441_v24 = vpop.permute.xlu2 %440 }
  0xaa   : > { %v511_v8 = vadd.f32 %v466_v3, %v415_v7  ;;  %531 = vmatpush.msra.mxu0 %v512_v6  ;;  %706 = vmatpush.msra.mxu1 %v512_v6  ;;  %v506_v29 = vadd.f32 %v441_v24, %v410_v26 }
  0xab   : > { %707 = vmatpush.msra.mxu2 %v512_v6  ;;  %708 = vmatpush.msra.mxu3 %v512_v6 }
  0xac   : > { %532 = vmatpush.msra.mxu0 %v511_v8  ;;  %709 = vmatpush.msra.mxu1 %v511_v8 }
  0xad   : > { %710 = vmatpush.msra.mxu2 %v511_v8  ;;  %711 = vmatpush.msra.mxu3 %v511_v8  ;;  %v365_v9 = vpop.permute.xlu0 %364 }
  0xae   : > { %v414_v12 = vmul.f32 %v891_v42, %v365_v9 }
  0xb1   : > { %v355_v10 = vpop.permute.xlu1 %354  ;;  %v330_v33 = vpop.permute.xlu2 %329 }
  0xb2   : > { %v412_v18 = vmul.f32 %v891_v42, %v355_v10  ;;  %v407_v37 = vmul.f32 %v891_v42, %v330_v33 }
  0xb5   : > { %v461_v13 = vpop.permute.xlu0 %460 }
  0xb6   : > { %v510_v16 = vadd.f32 %v461_v13, %v414_v12 }
  0xb8   : > { %533 = vmatpush.msra.mxu0 %v510_v16  ;;  %712 = vmatpush.msra.mxu1 %v510_v16 }
  0xb9   : > { %v451_v14 = vpop.permute.xlu1 %450  ;;  %713 = vmatpush.msra.mxu2 %v510_v16  ;;  %714 = vmatpush.msra.mxu3 %v510_v16  ;;  %v523_v50 = vpop.permute.xlu2 %522 }
  0xba   : > { %v508_v19 = vadd.f32 %v451_v14, %v412_v18  ;;  %534 = vmatpush.msra.mxu0 %v509_v17  ;;  %715 = vmatpush.msra.mxu1 %v509_v17 }
  0xbb   : > { %716 = vmatpush.msra.mxu2 %v509_v17  ;;  %717 = vmatpush.msra.mxu3 %v509_v17 }
  0xbc   : > { %535 = vmatpush.msra.mxu0 %v508_v19  ;;  %718 = vmatpush.msra.mxu1 %v508_v19 }
  0xbd   : > { %719 = vmatpush.msra.mxu2 %v508_v19  ;;  %720 = vmatpush.msra.mxu3 %v508_v19  ;;  %v350_v21 = vpop.permute.xlu0 %349 }
  0xbe   : > { %v411_v23 = vmul.f32 %v891_v42, %v350_v21 }
  0xc1   : > { %v340_v22 = vpop.permute.xlu1 %339 }
  0xc2   : > { %v409_v30 = vmul.f32 %v891_v42, %v340_v22 }
  0xc5   : > { %v446_v25 = vpop.permute.xlu0 %445 }
  0xc6   : > { %v507_v27 = vadd.f32 %v446_v25, %v411_v23 }
  0xc8   : > { %536 = vmatpush.msra.mxu0 %v507_v27  ;;  %721 = vmatpush.msra.mxu1 %v507_v27 }
  0xc9   : > { %v436_v28 = vpop.permute.xlu1 %435  ;;  %722 = vmatpush.msra.mxu2 %v507_v27  ;;  %723 = vmatpush.msra.mxu3 %v507_v27 }
  0xca   : > { %v505_v31 = vadd.f32 %v436_v28, %v409_v30  ;;  %537 = vmatpush.msra.mxu0 %v506_v29  ;;  %724 = vmatpush.msra.mxu1 %v506_v29 }
  0xcb   : > { %725 = vmatpush.msra.mxu2 %v506_v29  ;;  %726 = vmatpush.msra.mxu3 %v506_v29 }
  0xcc   : > { %538 = vmatpush.msra.mxu0 %v505_v31  ;;  %727 = vmatpush.msra.mxu1 %v505_v31 }
  0xcd   : > { %728 = vmatpush.msra.mxu2 %v505_v31  ;;  %729 = vmatpush.msra.mxu3 %v505_v31  ;;  %v335_v32 = vpop.permute.xlu0 %334 }
  0xce   : > { %v408_v34 = vmul.f32 %v891_v42, %v335_v32 }
  0xd1   : > { %v426_v35 = vpop.permute.xlu1 %425 }
  0xd2   : > { %v503_v39 = vadd.f32 %v426_v35, %v407_v37 }
  0xd5   : > { %v431_v36 = vpop.permute.xlu0 %430 }
  0xd6   : > { %v504_v38 = vadd.f32 %v431_v36, %v408_v34 }
  0xd8   : > { %539 = vmatpush.msra.mxu0 %v504_v38  ;;  %730 = vmatpush.msra.mxu1 %v504_v38 }
  0xd9   : > { %731 = vmatpush.msra.mxu2 %v504_v38  ;;  %732 = vmatpush.msra.mxu3 %v504_v38 }
  0xda   : > { %540 = vmatpush.msra.mxu0 %v503_v39  ;;  %733 = vmatpush.msra.mxu1 %v503_v39 }
  0xdb   : > { %734 = vmatpush.msra.mxu2 %v503_v39  ;;  %735 = vmatpush.msra.mxu3 %v503_v39 }
  0xdc   : > { %541 = vmatmul.f32.vlgmr.msra.gmra.mxu0 %v280_v40  ;;  %547 = vmatmul.f32.vlgmr.msra.gmra.mxu1 %v282_v41 }
  0xdd   : > { %553 = vmatmul.f32.vlgmr.msra.gmra.mxu2 %v284_v43  ;;  %559 = vmatmul.f32.vlgmr.msra.gmra.mxu3 %v286_v44  ;;  %v570_v49 = vpop.permute.xlu0 %569 }
  0xde   : > { %v572_v53 = vmul.f32 %v891_v42, %v570_v49 }
  0xe4   : > { %544 = vmatmul.f32.gmra.mxu0 %v281_v45  ;;  %550 = vmatmul.f32.gmra.mxu1 %v283_v46 }
  0xe5   : > { %556 = vmatmul.f32.gmra.mxu2 %v285_v47  ;;  %562 = vmatmul.f32.gmra.mxu3 %v287_v48 }
 0x159   : > { %v542_v51 = vpop.f32.mrf.mxu0  ;;  %v548_v52 = vpop.f32.mrf.mxu1 }
 0x15a   : > { %v543_v54 = vadd.f32 %v542_v51, %v523_v50  ;;  %v549_v55 = vadd.f32 %v548_v52, %v523_v50 }
 0x15c   : > { %v573_v56 = vadd.f32 %v572_v53, %v543_v54  ;;  %v575_v57 = vadd.f32 %v572_v53, %v549_v55 }
 0x15e   : > { %582 = vst.msk [vmem:[%s278_s0] sm:$0xff] %vm581_vm1, %v573_v56 }
 0x15f   : > { %584 = vst.msk [vmem:[%s278_s0 + $0x10] sm:$0xff] %vm581_vm1, %v575_v57 }
 0x160   : > { %v554_v58 = vpop.f32.mrf.mxu2  ;;  %v560_v59 = vpop.f32.mrf.mxu3 }
 0x161   : > { %v555_v60 = vadd.f32 %v554_v58, %v523_v50  ;;  %v561_v61 = vadd.f32 %v560_v59, %v523_v50  ;;  %v545_v62 = vpop.f32.mrf.mxu0  ;;  %v551_v42 = vpop.f32.mrf.mxu1 }
 0x162   : > { %v546_v63 = vadd.f32 %v545_v62, %v523_v50  ;;  %v552_v0 = vadd.f32 %v551_v42, %v523_v50 }
 0x163   : > { %v577_v1 = vadd.f32 %v572_v53, %v555_v60  ;;  %v579_v2 = vadd.f32 %v572_v53, %v561_v61 }
 0x164   : > { %v574_v3 = vadd.f32 %v572_v53, %v546_v63  ;;  %v576_v4 = vadd.f32 %v572_v53, %v552_v0 }
 0x165   : > { %586 = vst.msk [vmem:[%s278_s0 + $0x20] sm:$0xff] %vm581_vm1, %v577_v1 }
 0x166   : > { %588 = vst.msk [vmem:[%s278_s0 + $0x30] sm:$0xff] %vm581_vm1, %v579_v2 }
 0x167   : > { %583 = vst.msk [vmem:[%s278_s0 + $0x8] sm:$0xff] %vm581_vm1, %v574_v3 }
 0x168   : > { %585 = vst.msk [vmem:[%s278_s0 + $0x18] sm:$0xff] %vm581_vm1, %v576_v4  ;;  %v557_v5 = vpop.f32.mrf.mxu2  ;;  %v563_v6 = vpop.f32.mrf.mxu3 }
 0x169   : > { %v558_v7 = vadd.f32 %v557_v5, %v523_v50  ;;  %v564_v8 = vadd.f32 %v563_v6, %v523_v50 }
 0x16b   : > { %v578_v9 = vadd.f32 %v572_v53, %v558_v7  ;;  %v580_v10 = vadd.f32 %v572_v53, %v564_v8 }
 0x16d   : > { %587 = vst.msk [vmem:[%s278_s0 + $0x28] sm:$0xff] %vm581_vm1, %v578_v9 }
 0x16e   : > { %589 = vst.msk [vmem:[%s278_s0 + $0x38] sm:$0xff] %vm581_vm1, %v580_v10 }
 0x16f PF: > { %s19_s25 = sadd.s32 1, %s757_s25  }
 0x170   : > { %p16_p5 = scmp.ge.s32.totalorder %s19_s25, 6  }
 0x172   :  { %18 = sbr.rel (!%p16_p5) target bundleno = 3 (0x3), region = 76 }

</bundles_post_ra>
